<compile_context>
chip_gen: v7x
topology: tpu7x:2x2x1
jax: 0.10.0
libtpu: 0.0.40
codegen_flags: <defaults>
</compile_context>

<pallas_src>
import jax
import jax.numpy as jnp
from jax.experimental import pallas as pl
from jax.experimental.pallas import tpu as pltpu

BN_EPS = 1e-5
MATMUL_DTYPE = jnp.bfloat16   # MXU inputs only; elementwise math stays f32.

_PARALLEL = pltpu.CompilerParams(dimension_semantics=("parallel",))


def _round_up(x, m):
    return (x + m - 1) // m * m


def _pick_tile_r(r):
    # Biggest row tile that still leaves a multi-step (pipelined) grid.
    for t in (512, 256, 128, 64, 32, 16, 8):
        if r >= 4 * t:
            return t
    return 8


# ---------------------------------------------------------------------------
# Kernels
# ---------------------------------------------------------------------------

def conv_stats_kernel(cols_ref, w_ref, y_ref, stats_ref):
    """Conv as im2col matmul (bf16 in, f32 acc) + per-tile channel sum / sumsq
    (BatchNorm pass 1).  Conv bias intentionally omitted (cancelled by BN)."""
    acc = jnp.dot(cols_ref[...], w_ref[...], preferred_element_type=jnp.float32)
    y_ref[...] = acc
    s = jnp.sum(acc, axis=0, keepdims=True)          # (1, Cout_pad)
    ss = jnp.sum(acc * acc, axis=0, keepdims=True)   # (1, Cout_pad)
    stats_ref[0] = jnp.concatenate([s, ss], axis=0)  # (2, Cout_pad)


def bn_relu_kernel(y_ref, scale_ref, shift_ref, o_ref):
    """BatchNorm pass 2: folded scale/shift + ReLU.  f32 math, bf16 output."""
    z = y_ref[...] * scale_ref[...] + shift_ref[...]
    o_ref[...] = jnp.maximum(z, 0.0).astype(o_ref.dtype)


def conv_bias_res_kernel(cols_ref, w_ref, b_ref, res_ref, o_ref):
    """Conv as im2col matmul + bias + residual add (f32 epilogue)."""
    acc = jnp.dot(cols_ref[...], w_ref[...], preferred_element_type=jnp.float32)
    o_ref[...] = (acc + b_ref[...] + res_ref[...]).astype(o_ref.dtype)


# ---------------------------------------------------------------------------
# pallas_call wrappers
# ---------------------------------------------------------------------------

def _conv_stats_call(cols, w_mat, tile_r):
    r_pad, k_pad = cols.shape
    cout_pad = w_mat.shape[1]
    num_tiles = r_pad // tile_r
    return pl.pallas_call(
        conv_stats_kernel,
        grid=(num_tiles,),
        out_shape=(jax.ShapeDtypeStruct((r_pad, cout_pad), jnp.float32),
                   jax.ShapeDtypeStruct((num_tiles, 2, cout_pad), jnp.float32)),
        in_specs=[pl.BlockSpec((tile_r, k_pad), lambda i: (i, 0)),
                  pl.BlockSpec((k_pad, cout_pad), lambda i: (0, 0))],
        out_specs=(pl.BlockSpec((tile_r, cout_pad), lambda i: (i, 0)),
                   pl.BlockSpec((1, 2, cout_pad), lambda i: (i, 0, 0))),
        compiler_params=_PARALLEL,
    )(cols, w_mat)


def _bn_relu_call(y_rows, scale, shift, tile_r, out_dtype):
    r_pad, cout_pad = y_rows.shape
    num_tiles = r_pad // tile_r
    return pl.pallas_call(
        bn_relu_kernel,
        grid=(num_tiles,),
        out_shape=jax.ShapeDtypeStruct((r_pad, cout_pad), out_dtype),
        in_specs=[pl.BlockSpec((tile_r, cout_pad), lambda i: (i, 0)),
                  pl.BlockSpec((1, cout_pad), lambda i: (0, 0)),
                  pl.BlockSpec((1, cout_pad), lambda i: (0, 0))],
        out_specs=pl.BlockSpec((tile_r, cout_pad), lambda i: (i, 0)),
        compiler_params=_PARALLEL,
    )(y_rows, scale, shift)


def _conv_bias_res_call(cols, w_mat, bias, res_rows, tile_r):
    r_pad, k_pad = cols.shape
    cout_pad = w_mat.shape[1]
    num_tiles = r_pad // tile_r
    return pl.pallas_call(
        conv_bias_res_kernel,
        grid=(num_tiles,),
        out_shape=jax.ShapeDtypeStruct((r_pad, cout_pad), jnp.float32),
        in_specs=[pl.BlockSpec((tile_r, k_pad), lambda i: (i, 0)),
                  pl.BlockSpec((k_pad, cout_pad), lambda i: (0, 0)),
                  pl.BlockSpec((1, cout_pad), lambda i: (0, 0)),
                  pl.BlockSpec((tile_r, cout_pad), lambda i: (i, 0))],
        out_specs=pl.BlockSpec((tile_r, cout_pad), lambda i: (i, 0)),
        compiler_params=_PARALLEL,
    )(cols, w_mat, bias, res_rows)


# ---------------------------------------------------------------------------
# Layout glue
# ---------------------------------------------------------------------------

def _im2col_same3x3(x_nhwc, dtype):
    """3x3 'same' conv patches -> (N*H*W, 9*C) rows."""
    n, h, w, c = x_nhwc.shape
    xp = jnp.pad(x_nhwc, ((0, 0), (1, 1), (1, 1), (0, 0))).astype(dtype)
    cols = [xp[:, i:i + h, j:j + w, :].reshape(n * h * w, c)
            for i in range(3) for j in range(3)]
    return jnp.concatenate(cols, axis=1)


def _w_mat(w_oihw, k_pad, cout_pad, dtype):
    cout, cin, kh, kw = w_oihw.shape
    m = jnp.transpose(w_oihw, (2, 3, 1, 0)).reshape(kh * kw * cin, cout)
    m = jnp.pad(m, ((0, k_pad - kh * kw * cin), (0, cout_pad - cout)))
    return m.astype(dtype)


# ---------------------------------------------------------------------------
# up_block forward
# ---------------------------------------------------------------------------

def up_block_forward(inputs, plus_in, params):
    (bn1_g, bn1_b, conv1_w, conv1_b, bn2_g, bn2_b, conv2_w, conv2_b) = params
    del conv1_b  # exactly cancelled by the BatchNorm that follows conv1
    n, c, h, w = inputs.shape
    ho, wo = 2 * h, 2 * w
    c2 = 2 * c
    assert plus_in.shape == (n, c, ho, wo)

    # ---- glue: nearest 2x upsample (NCHW) ----
    up = jnp.repeat(jnp.repeat(inputs, 2, axis=2), 2, axis=3)

    # ---- BN1 (training-mode batch stats) + ReLU on the upsample.
    # Nearest 2x replicates each pixel 4x, so batch mean / biased var of `up`
    # equal those of `inputs` exactly.
    m1 = jnp.mean(inputs, axis=(0, 2, 3))
    v1 = jnp.mean((inputs - m1[None, :, None, None]) ** 2, axis=(0, 2, 3))
    inv1 = jax.lax.rsqrt(v1 + BN_EPS)
    scale1 = bn1_g * inv1
    shift1 = bn1_b - m1 * scale1

    up_nhwc = jnp.transpose(up, (0, 2, 3, 1))                       # (N, Ho, Wo, C)
    x1 = jnp.maximum(up_nhwc * scale1 + shift1, 0.0)
    xcat = jnp.concatenate([x1, jnp.transpose(plus_in, (0, 2, 3, 1))], axis=-1)

    # ---- sizes / padding (Cout -> 128 lanes, K -> multiple of 8) ----
    r = n * ho * wo
    tile_r = _pick_tile_r(r)
    r_pad = _round_up(r, tile_r)
    k1 = 9 * c2
    k1_pad = _round_up(k1, 8)
    c2_pad = _round_up(c2, 128)
    c1_pad = _round_up(c, 128)

    # ---- conv1 + BN2 pass-1 stats (row-tiled Pallas) ----
    cols1 = _im2col_same3x3(xcat, MATMUL_DTYPE)
    cols1 = jnp.pad(cols1, ((0, r_pad - r), (0, k1_pad - k1)))
    w1_mat = _w_mat(conv1_w, k1_pad, c2_pad, MATMUL_DTYPE)
    y1_rows, stats = _conv_stats_call(cols1, w1_mat, tile_r)

    # ---- BN2 statistics: reduce per-tile partials (tiny, f32) ----
    tot = jnp.sum(stats, axis=0)                                    # (2, c2_pad)
    mean2 = tot[0] / r
    var2 = jnp.maximum(tot[1] / r - mean2 ** 2, 0.0)                # biased variance
    g2 = jnp.pad(bn2_g.astype(jnp.float32), (0, c2_pad - c2))
    b2 = jnp.pad(bn2_b.astype(jnp.float32), (0, c2_pad - c2))
    inv2 = jax.lax.rsqrt(var2 + BN_EPS)
    scale2 = (g2 * inv2).reshape(1, c2_pad)
    shift2 = (b2 - mean2 * g2 * inv2).reshape(1, c2_pad)

    # ---- BN2 pass-2 normalize + ReLU (row-tiled Pallas) ----
    x2_rows = _bn_relu_call(y1_rows, scale2, shift2, tile_r, MATMUL_DTYPE)

    # ---- conv2 + bias + residual add (row-tiled Pallas) ----
    x2 = x2_rows[:r, :c2].reshape(n, ho, wo, c2)
    k2 = 9 * c2
    k2_pad = _round_up(k2, 8)
    cols2 = _im2col_same3x3(x2, MATMUL_DTYPE)
    cols2 = jnp.pad(cols2, ((0, r_pad - r), (0, k2_pad - k2)))
    w2_mat = _w_mat(conv2_w, k2_pad, c1_pad, MATMUL_DTYPE)
    bias2 = jnp.pad(conv2_b.astype(jnp.float32), (0, c1_pad - c)).reshape(1, c1_pad)
    res_rows = jnp.pad(up_nhwc.reshape(r, c).astype(jnp.float32),
                       ((0, r_pad - r), (0, c1_pad - c)))
    out_rows = _conv_bias_res_call(cols2, w2_mat, bias2, res_rows, tile_r)

    out = out_rows[:r, :c].reshape(n, ho, wo, c)
    return jnp.transpose(out, (0, 3, 1, 2)).astype(inputs.dtype)


# ---------------------------------------------------------------------------
# Pure-JAX reference matching PyTorch semantics (sanity check)
# ---------------------------------------------------------------------------

def reference_forward(inputs, plus_in, params):
    (bn1_g, bn1_b, conv1_w, conv1_b, bn2_g, bn2_b, conv2_w, conv2_b) = params

    def bn_relu(x, g, b):
        m = jnp.mean(x, axis=(0, 2, 3), keepdims=True)
        v = jnp.mean((x - m) ** 2, axis=(0, 2, 3), keepdims=True)
        y = (x - m) * jax.lax.rsqrt(v + BN_EPS)
        y = y * g.reshape(1, -1, 1, 1) + b.reshape(1, -1, 1, 1)
        return jnp.maximum(y, 0.0)

    def conv(x, wgt, b):
        y = jax.lax.conv_general_dilated(
            x, wgt, window_strides=(1, 1), padding="SAME",
            dimension_numbers=("NCHW", "OIHW", "NCHW"))
        return y + b.reshape(1, -1, 1, 1)

    up = jnp.repeat(jnp.repeat(inputs, 2, axis=2), 2, axis=3)
    x = bn_relu(up, bn1_g, bn1_b)
    x = jnp.concatenate([x, plus_in], axis=1)
    x = conv(x, conv1_w, conv1_b)
    x = bn_relu(x, bn2_g, bn2_b)
    x = conv(x, conv2_w, conv2_b)
    return x + up


if __name__ == "__main__":
    # up_block(in_channels=4); upsampled spatial = 16x16.
    N, C, H, W = 2, 4, 8, 8
    C2 = 2 * C

    key = jax.random.PRNGKey(0)
    k_in, k_plus, kw1, kb1, kw2, kb2 = jax.random.split(key, 6)

    inputs = jax.random.normal(k_in, (N, C, H, W), dtype=jnp.float32)
    plus_in = jax.random.normal(k_plus, (N, C, 2 * H, 2 * W), dtype=jnp.float32)

    # Conv2d default-style (kaiming-uniform-like) init, deterministic in-script.
    fan = C2 * 9
    bound = 1.0 / (fan ** 0.5)
    conv1_w = jax.random.uniform(kw1, (C2, C2, 3, 3), jnp.float32, -bound, bound)
    conv1_b = jax.random.uniform(kb1, (C2,), jnp.float32, -bound, bound)
    conv2_w = jax.random.uniform(kw2, (C, C2, 3, 3), jnp.float32, -bound, bound)
    conv2_b = jax.random.uniform(kb2, (C,), jnp.float32, -bound, bound)

    # BatchNorm2d default init: weight=1, bias=0.
    bn1_g, bn1_b = jnp.ones((C,), jnp.float32), jnp.zeros((C,), jnp.float32)
    bn2_g, bn2_b = jnp.ones((C2,), jnp.float32), jnp.zeros((C2,), jnp.float32)

    params = (bn1_g, bn1_b, conv1_w, conv1_b, bn2_g, bn2_b, conv2_w, conv2_b)

    fwd = jax.jit(up_block_forward)
    out = jax.block_until_ready(fwd(inputs, plus_in, params))
    ref = jax.block_until_ready(reference_forward(inputs, plus_in, params))

    assert out.shape == (N, C, 2 * H, 2 * W), out.shape
    max_err = float(jnp.max(jnp.abs(out - ref)))
    assert jnp.allclose(out, ref, atol=5e-2, rtol=5e-2), max_err

    print("KERNEL_OK")
</pallas_src>

<mosaic_0001>
module attributes {stable_mosaic.version = 11 : i64} {
  func.func @conv_stats_kernel(%arg0: i32, %arg1: memref<128x72xbf16, #tpu.memory_space<vmem>>, %arg2: memref<72x128xbf16, #tpu.memory_space<vmem>>, %arg3: memref<128x128xf32, #tpu.memory_space<vmem>>, %arg4: memref<1x2x128xf32, #tpu.memory_space<vmem>>) attributes {dimension_semantics = [#tpu.dimension_semantics<parallel>], iteration_bounds = array<i64: 4>, scalar_prefetch = 0 : i64, scratch_operands = 0 : i64, tpu.core_type = #tpu.core_type<tc>, window_params = [{transform_indices = @transform_0, window_bounds = array<i64: 128, 72>}, {pipeline_mode = #tpu.pipeline_mode<synchronous>, transform_indices = @transform_1, window_bounds = array<i64: 72, 128>}, {transform_indices = @transform_2, window_bounds = array<i64: 128, 128>}, {transform_indices = @transform_3, window_bounds = array<i64: 1, 2, 128>}]} {
    %c0 = arith.constant 0 : index
    %c0_0 = arith.constant 0 : index
    %0 = vector.load %arg1[%c0, %c0_0] : memref<128x72xbf16, #tpu.memory_space<vmem>>, vector<128x72xbf16>
    %c0_1 = arith.constant 0 : index
    %c0_2 = arith.constant 0 : index
    %1 = vector.load %arg2[%c0_1, %c0_2] : memref<72x128xbf16, #tpu.memory_space<vmem>>, vector<72x128xbf16>
    %cst = arith.constant dense<0.000000e+00> : vector<128x128xf32>
    %2 = tpu.matmul %0, %1, %cst {dimension_numbers = #tpu.dot_dimension_numbers<[1], [0], [0], [1], [0, 0, 1, 1], [], []>} : vector<128x72xbf16>, vector<72x128xbf16>, vector<128x128xf32> -> vector<128x128xf32>
    %c0_3 = arith.constant 0 : index
    %c0_4 = arith.constant 0 : index
    %3 = vector.load %arg3[%c0_3, %c0_4] : memref<128x128xf32, #tpu.memory_space<vmem>>, vector<128x128xf32>
    tpu.vector_store %arg3[%c0_3, %c0_4], %2 {strides = array<i32>} : memref<128x128xf32, #tpu.memory_space<vmem>>, vector<128x128xf32>,
    %cst_5 = arith.constant dense<0.000000e+00> : vector<128xf32>
    %4 = vector.multi_reduction <add>, %2, %cst_5 [0] : vector<128x128xf32> to vector<128xf32>
    %5 = vector.shape_cast %4 : vector<128xf32> to vector<1x128xf32>
    %6 = arith.mulf %2, %2 : vector<128x128xf32>
    %cst_6 = arith.constant dense<0.000000e+00> : vector<128xf32>
    %7 = vector.multi_reduction <add>, %6, %cst_6 [0] : vector<128x128xf32> to vector<128xf32>
    %8 = vector.shape_cast %7 : vector<128xf32> to vector<1x128xf32>
    %9 = tpu.concatenate %5, %8 in 0 : vector<1x128xf32>, vector<1x128xf32> -> vector<2x128xf32>
    %c0_7 = arith.constant 0 : index
    %c0_8 = arith.constant 0 : index
    %c0_9 = arith.constant 0 : index
    %10 = vector.load %arg4[%c0_7, %c0_8, %c0_9] : memref<1x2x128xf32, #tpu.memory_space<vmem>>, vector<1x2x128xf32>
    %11 = vector.shape_cast %10 : vector<1x2x128xf32> to vector<2x128xf32>
    %12 = vector.shape_cast %9 : vector<2x128xf32> to vector<1x2x128xf32>
    tpu.vector_store %arg4[%c0_7, %c0_8, %c0_9], %12 {strides = array<i32>} : memref<1x2x128xf32, #tpu.memory_space<vmem>>, vector<1x2x128xf32>,
    return
  }
  func.func @transform_0(%arg0: i32) -> (i32, i32) {
    %c0_i32 = arith.constant 0 : i32
    %c0_i32_0 = arith.constant 0 : i32
    return %arg0, %c0_i32 : i32, i32
  }
  func.func @transform_1(%arg0: i32) -> (i32, i32) {
    %c0_i32 = arith.constant 0 : i32
    %c0_i32_0 = arith.constant 0 : i32
    %c0_i32_1 = arith.constant 0 : i32
    return %c0_i32, %c0_i32_0 : i32, i32
  }
  func.func @transform_2(%arg0: i32) -> (i32, i32) {
    %c0_i32 = arith.constant 0 : i32
    %c0_i32_0 = arith.constant 0 : i32
    return %arg0, %c0_i32 : i32, i32
  }
  func.func @transform_3(%arg0: i32) -> (i32, i32, i32) {
    %c0_i32 = arith.constant 0 : i32
    %c0_i32_0 = arith.constant 0 : i32
    %c0_i32_1 = arith.constant 0 : i32
    return %arg0, %c0_i32, %c0_i32_0 : i32, i32, i32
  }
}

module attributes {stable_mosaic.version = 11 : i64} {
  func.func @bn_relu_kernel(%arg0: i32, %arg1: memref<128x128xf32, #tpu.memory_space<vmem>>, %arg2: memref<1x128xf32, #tpu.memory_space<vmem>>, %arg3: memref<1x128xf32, #tpu.memory_space<vmem>>, %arg4: memref<128x128xbf16, #tpu.memory_space<vmem>>) attributes {dimension_semantics = [#tpu.dimension_semantics<parallel>], iteration_bounds = array<i64: 4>, scalar_prefetch = 0 : i64, scratch_operands = 0 : i64, tpu.core_type = #tpu.core_type<tc>, window_params = [{transform_indices = @transform_0, window_bounds = array<i64: 128, 128>}, {pipeline_mode = #tpu.pipeline_mode<synchronous>, transform_indices = @transform_1, window_bounds = array<i64: 1, 128>}, {pipeline_mode = #tpu.pipeline_mode<synchronous>, transform_indices = @transform_2, window_bounds = array<i64: 1, 128>}, {transform_indices = @transform_3, window_bounds = array<i64: 128, 128>}]} {
    %c0 = arith.constant 0 : index
    %c0_0 = arith.constant 0 : index
    %0 = vector.load %arg1[%c0, %c0_0] : memref<128x128xf32, #tpu.memory_space<vmem>>, vector<128x128xf32>
    %c0_1 = arith.constant 0 : index
    %c0_2 = arith.constant 0 : index
    %1 = vector.load %arg2[%c0_1, %c0_2] : memref<1x128xf32, #tpu.memory_space<vmem>>, vector<1x128xf32>
    %2 = vector.broadcast %1 : vector<1x128xf32> to vector<128x128xf32>
    %3 = arith.mulf %0, %2 : vector<128x128xf32>
    %c0_3 = arith.constant 0 : index
    %c0_4 = arith.constant 0 : index
    %4 = vector.load %arg3[%c0_3, %c0_4] : memref<1x128xf32, #tpu.memory_space<vmem>>, vector<1x128xf32>
    %5 = vector.broadcast %4 : vector<1x128xf32> to vector<128x128xf32>
    %6 = arith.addf %3, %5 : vector<128x128xf32>
    %cst = arith.constant 0.000000e+00 : f32
    %7 = vector.broadcast %cst : f32 to vector<128x128xf32>
    %8 = arith.maximumf %6, %7 : vector<128x128xf32>
    %9 = arith.truncf %8 : vector<128x128xf32> to vector<128x128xbf16>
    %c0_5 = arith.constant 0 : index
    %c0_6 = arith.constant 0 : index
    %10 = vector.load %arg4[%c0_5, %c0_6] : memref<128x128xbf16, #tpu.memory_space<vmem>>, vector<128x128xbf16>
    tpu.vector_store %arg4[%c0_5, %c0_6], %9 {strides = array<i32>} : memref<128x128xbf16, #tpu.memory_space<vmem>>, vector<128x128xbf16>,
    return
  }
  func.func @transform_0(%arg0: i32) -> (i32, i32) {
    %c0_i32 = arith.constant 0 : i32
    %c0_i32_0 = arith.constant 0 : i32
    return %arg0, %c0_i32 : i32, i32
  }
  func.func @transform_1(%arg0: i32) -> (i32, i32) {
    %c0_i32 = arith.constant 0 : i32
    %c0_i32_0 = arith.constant 0 : i32
    %c0_i32_1 = arith.constant 0 : i32
    return %c0_i32, %c0_i32_0 : i32, i32
  }
  func.func @transform_2(%arg0: i32) -> (i32, i32) {
    %c0_i32 = arith.constant 0 : i32
    %c0_i32_0 = arith.constant 0 : i32
    %c0_i32_1 = arith.constant 0 : i32
    return %c0_i32, %c0_i32_0 : i32, i32
  }
  func.func @transform_3(%arg0: i32) -> (i32, i32) {
    %c0_i32 = arith.constant 0 : i32
    %c0_i32_0 = arith.constant 0 : i32
    return %arg0, %c0_i32 : i32, i32
  }
}

module attributes {stable_mosaic.version = 11 : i64} {
  func.func @conv_bias_res_kernel(%arg0: i32, %arg1: memref<128x72xbf16, #tpu.memory_space<vmem>>, %arg2: memref<72x128xbf16, #tpu.memory_space<vmem>>, %arg3: memref<1x128xf32, #tpu.memory_space<vmem>>, %arg4: memref<128x128xf32, #tpu.memory_space<vmem>>, %arg5: memref<128x128xf32, #tpu.memory_space<vmem>>) attributes {dimension_semantics = [#tpu.dimension_semantics<parallel>], iteration_bounds = array<i64: 4>, scalar_prefetch = 0 : i64, scratch_operands = 0 : i64, tpu.core_type = #tpu.core_type<tc>, window_params = [{transform_indices = @transform_0, window_bounds = array<i64: 128, 72>}, {pipeline_mode = #tpu.pipeline_mode<synchronous>, transform_indices = @transform_1, window_bounds = array<i64: 72, 128>}, {pipeline_mode = #tpu.pipeline_mode<synchronous>, transform_indices = @transform_2, window_bounds = array<i64: 1, 128>}, {transform_indices = @transform_3, window_bounds = array<i64: 128, 128>}, {transform_indices = @transform_4, window_bounds = array<i64: 128, 128>}]} {
    %c0 = arith.constant 0 : index
    %c0_0 = arith.constant 0 : index
    %0 = vector.load %arg1[%c0, %c0_0] : memref<128x72xbf16, #tpu.memory_space<vmem>>, vector<128x72xbf16>
    %c0_1 = arith.constant 0 : index
    %c0_2 = arith.constant 0 : index
    %1 = vector.load %arg2[%c0_1, %c0_2] : memref<72x128xbf16, #tpu.memory_space<vmem>>, vector<72x128xbf16>
    %cst = arith.constant dense<0.000000e+00> : vector<128x128xf32>
    %2 = tpu.matmul %0, %1, %cst {dimension_numbers = #tpu.dot_dimension_numbers<[1], [0], [0], [1], [0, 0, 1, 1], [], []>} : vector<128x72xbf16>, vector<72x128xbf16>, vector<128x128xf32> -> vector<128x128xf32>
    %c0_3 = arith.constant 0 : index
    %c0_4 = arith.constant 0 : index
    %3 = vector.load %arg3[%c0_3, %c0_4] : memref<1x128xf32, #tpu.memory_space<vmem>>, vector<1x128xf32>
    %4 = vector.broadcast %3 : vector<1x128xf32> to vector<128x128xf32>
    %5 = arith.addf %2, %4 : vector<128x128xf32>
    %c0_5 = arith.constant 0 : index
    %c0_6 = arith.constant 0 : index
    %6 = vector.load %arg4[%c0_5, %c0_6] : memref<128x128xf32, #tpu.memory_space<vmem>>, vector<128x128xf32>
    %7 = arith.addf %5, %6 : vector<128x128xf32>
    %c0_7 = arith.constant 0 : index
    %c0_8 = arith.constant 0 : index
    %8 = vector.load %arg5[%c0_7, %c0_8] : memref<128x128xf32, #tpu.memory_space<vmem>>, vector<128x128xf32>
    tpu.vector_store %arg5[%c0_7, %c0_8], %7 {strides = array<i32>} : memref<128x128xf32, #tpu.memory_space<vmem>>, vector<128x128xf32>,
    return
  }
  func.func @transform_0(%arg0: i32) -> (i32, i32) {
    %c0_i32 = arith.constant 0 : i32
    %c0_i32_0 = arith.constant 0 : i32
    return %arg0, %c0_i32 : i32, i32
  }
  func.func @transform_1(%arg0: i32) -> (i32, i32) {
    %c0_i32 = arith.constant 0 : i32
    %c0_i32_0 = arith.constant 0 : i32
    %c0_i32_1 = arith.constant 0 : i32
    return %c0_i32, %c0_i32_0 : i32, i32
  }
  func.func @transform_2(%arg0: i32) -> (i32, i32) {
    %c0_i32 = arith.constant 0 : i32
    %c0_i32_0 = arith.constant 0 : i32
    %c0_i32_1 = arith.constant 0 : i32
    return %c0_i32, %c0_i32_0 : i32, i32
  }
  func.func @transform_3(%arg0: i32) -> (i32, i32) {
    %c0_i32 = arith.constant 0 : i32
    %c0_i32_0 = arith.constant 0 : i32
    return %arg0, %c0_i32 : i32, i32
  }
  func.func @transform_4(%arg0: i32) -> (i32, i32) {
    %c0_i32 = arith.constant 0 : i32
    %c0_i32_0 = arith.constant 0 : i32
    return %arg0, %c0_i32 : i32, i32
  }
}

</mosaic_0001>

<bundles_post_ra>
// kernel: up_block_forward.3
= control target key start
LH: loop header
LB: loop body
LE: loop exit
PB: predicated region body
PF: predicated region fallthrough
CT: control target
= control target key end

     0   :  { %s701_s12 = smov 0   ;;  %s771_s0 = inlined_call_operand.vmem [shape: bf16[512,72], index: 0, kind: input, shape index: {}]   ;;  %s772_s1 = inlined_call_operand.vmem [shape: bf16[72,128], index: 1, kind: input, shape index: {}]   ;;  %s773_s2 = inlined_call_operand.vmem [shape: f32[512,128], index: 2, kind: output, shape index: {0}]   ;;  %s774_s3 = inlined_call_operand.vmem [shape: f32[4,2,128], index: 3, kind: output, shape index: {1}]  }
   0x1 LB: > { %s707_s13 = sadd.s32 4294967295, %s679_s12   ;;  %p572_p0 = scmp.ge.s32.totalorder %s679_s12, 1  ;;  %s679_s12 = sphi %s701_s12, %s14_s12  }
   0x2   : > { %p141_p1 = scmp.lt.s32.totalorder %s679_s12, 5 }
   0x4   : > { %p142_p2 = pnand %p572_p0, %p141_p1 }
   0x5   : > { %v660_v0 = vld [vmem:[%s772_s1] sm:$0xff] (!%p142_p2)   ;;  %v661_v1 = vld [vmem:[%s772_s1 + $0x8] sm:$0xff] (!%p142_p2)   ;;  %s573_s18 = sshll.u32 (!%p142_p2), %s707_s13, 4  ;;  %v662_v2 = vld [vmem:[%s772_s1 + $0x10] sm:$0xff] (!%p142_p2)   ;;  %vm278_vm0 = vcmask (!%p142_p2), 588800   ;;  %vm303_vm1 = vcmask (!%p142_p2), 1043456  }
   0x6   : > { %145 = sbr.rel (%p142_p2) target bundleno = 287 (0x11f), region = 28  ;;  %614 = vmatprep.subr.bf16.mxu0 (!%p142_p2), %v660_v0  ;;  %640 = vmatprep.subr.bf16.mxu1 (!%p142_p2), %v660_v0  ;;  %p170_p3 = scmp.lt.s32.totalorder (!%p142_p2), %s573_s18, 63  ;;  %v663_v3 = vld [vmem:[%s772_s1 + $0x18] sm:$0xff] (!%p142_p2)   ;;  %v664_v5 = vld [vmem:[%s772_s1 + $0x20] ss:$0 sps:$4 sm:$0xff] (!%p142_p2)   ;;  %vm478_vm2 = vcmask (!%p142_p2), 1040384  }
   0x7   : > { %615 = vmatpush3.bf16.msra.mxu0 (!%p142_p2), %v660_v0  ;;  %645 = vmatpush3.bf16.msra.mxu1 (!%p142_p2), %v660_v0  ;;  %v305_v7 = vsel (!%p142_p2), %vm303_vm1, %v664_v5, 0  ;;  %p181_p4 = scmp.lt.s32.totalorder (!%p142_p2), %s707_s13, 3 }
   0x8   : > { %616 = vmatprep.subr.bf16.mxu0 (!%p142_p2), %v661_v1  ;;  %641 = vmatprep.subr.bf16.mxu1 (!%p142_p2), %v661_v1 }
   0xb   : > { %617 = vmatpush3.bf16.msra.mxu0 (!%p142_p2), %v661_v1  ;;  %646 = vmatpush3.bf16.msra.mxu1 (!%p142_p2), %v661_v1 }
   0xc   : > { %618 = vmatprep.subr.bf16.mxu0 (!%p142_p2), %v662_v2  ;;  %642 = vmatprep.subr.bf16.mxu1 (!%p142_p2), %v662_v2 }
   0xd   : > { %s776_s18 = smov (!%p170_p3, %s573_s18), 63  ;;  %s778_s13 = smov (!%p181_p4, %s707_s13), 3 }
   0xe   : > { %s574_s21 = sshll.u32 %s776_s18, 2  ;;  %s576_s29 = sshll.u32 %s776_s18, 3 }
   0xf   : > { %s173_s26 = scalar_lea.vmem %s771_s0, %s574_s21  ;;  %619 = vmatpush3.bf16.msra.mxu0 %v662_v2  ;;  %647 = vmatpush3.bf16.msra.mxu1 %v662_v2  ;;  %s745_s5 = scalar_lea.vmem %s773_s2, %s576_s29 }
  0x10   : > { %v665_v4 = vld [vmem:[%s173_s26] sm:$0xff]   ;;  %620 = vmatprep.subr.bf16.mxu0 %v663_v3  ;;  %643 = vmatprep.subr.bf16.mxu1 %v663_v3  ;;  %v666_v8 = vld [vmem:[%s173_s26 + $0x8] sm:$0xff]   ;;  %v667_v10 = vld [vmem:[%s173_s26 + $0x10] sm:$0xff]   ;;  %s577_s6 = sshll.u32 %s778_s13, 1 }
  0x11   : > { %624 = vmatprep.mubr.msk.bf16.mxu0 %vm278_vm0, %v665_v4  ;;  %v669_v6 = vld [vmem:[%s173_s26 + $0x20] sm:$0xff]   ;;  %v670_v9 = vld [vmem:[%s173_s26 + $0x28] sm:$0xff]   ;;  %v671_v11 = vld [vmem:[%s173_s26 + $0x30] sm:$0xff]   ;;  %s184_s9 = scalar_lea.vmem %s774_s3, %s577_s6 }
  0x12   : > { %632 = vmatprep.mubr.msk.bf16.mxu1 %vm278_vm0, %v669_v6  ;;  %v668_v12 = vld [vmem:[%s173_s26 + $0x18] sm:$0xff]  }
  0x13   : > { %621 = vmatpush3.bf16.msra.mxu0 %v663_v3  ;;  %648 = vmatpush3.bf16.msra.mxu1 %v663_v3  ;;  %v672_v13 = vld [vmem:[%s173_s26 + $0x38] sm:$0xff]  }
  0x14   : > { %650 = vmatprep.subr.msk.bf16.mxu0 %vm303_vm1, %v664_v5  ;;  %651 = vmatprep.subr.msk.bf16.mxu1 %vm303_vm1, %v664_v5 }
  0x17   : > { %623 = vmatpush3.bf16.msra.mxu0 %v305_v7  ;;  %649 = vmatpush3.bf16.msra.mxu1 %v305_v7 }
  0x1a   : > { %625 = vmatmul.mubr.msk.bf16.vlgmr.msra.gmra.mrb[0].mxu0 %vm278_vm0, %v666_v8  ;;  %633 = vmatmul.mubr.msk.bf16.vlgmr.msra.gmra.mrb[0].mxu1 %vm278_vm0, %v670_v9 }
  0x1b   : > { %628 = vmatprep.mubr.msk.bf16.mxu0 %vm278_vm0, %v667_v10  ;;  %636 = vmatprep.mubr.msk.bf16.mxu1 %vm278_vm0, %v671_v11 }
  0x22   : > { %629 = vmatmul.mubr.msk.bf16.gmra.mrb[4].mxu0 %vm278_vm0, %v668_v12  ;;  %637 = vmatmul.mubr.msk.bf16.gmra.mrb[4].mxu1 %vm278_vm0, %v672_v13 }
  0xed   : > { %v626_v14 = vpop.f32.mrb[0].mxu0  ;;  %v634_v15 = vpop.f32.mrb[0].mxu1 }
  0xee   : > { %406 = vst [vmem:[%s745_s5 + $0x10] sm:$0xff] %v626_v14  ;;  %v341_v16 = vpop.f32.mrb[1].mxu0  ;;  %414 = vst [vmem:[%s745_s5 + $0x50] sm:$0xff] %v634_v15  ;;  %v373_v17 = vpop.f32.mrb[1].mxu1  ;;  %v443_v25 = vmul.f32 %v626_v14, %v626_v14  ;;  %v451_v57 = vmul.f32 %v634_v15, %v634_v15 }
  0xef   : > { %404 = vst [vmem:[%s745_s5] sm:$0xff] %v341_v16  ;;  %v627_v18 = vpop.f32.mrb[2].mxu0  ;;  %412 = vst [vmem:[%s745_s5 + $0x40] sm:$0xff] %v373_v17  ;;  %v635_v19 = vpop.f32.mrb[2].mxu1  ;;  %v441_v22 = vmul.f32 %v341_v16, %v341_v16  ;;  %v449_v51 = vmul.f32 %v373_v17, %v373_v17 }
  0xf0   : > { %407 = vst [vmem:[%s745_s5 + $0x18] sm:$0xff] %v627_v18  ;;  %v344_v20 = vpop.f32.mrb[3].mxu0  ;;  %415 = vst [vmem:[%s745_s5 + $0x58] sm:$0xff] %v635_v19  ;;  %v376_v21 = vpop.f32.mrb[3].mxu1  ;;  %v444_v28 = vmul.f32 %v627_v18, %v627_v18  ;;  %v452_v60 = vmul.f32 %v635_v19, %v635_v19 }
  0xf1   : > { %405 = vst [vmem:[%s745_s5 + $0x8] sm:$0xff] %v344_v20  ;;  %v420_v23 = vadd.f32 %v344_v20, %v341_v16  ;;  %v442_v24 = vmul.f32 %v344_v20, %v344_v20  ;;  %413 = vst [vmem:[%s745_s5 + $0x48] sm:$0xff] %v376_v21  ;;  %v450_v56 = vmul.f32 %v376_v21, %v376_v21 }
  0xf3   : > { %v421_v26 = vadd.f32 %v626_v14, %v420_v23  ;;  %v457_v27 = vadd.f32 %v442_v24, %v441_v22 }
  0xf5   : > { %v458_v29 = vadd.f32 %v457_v27, %v443_v25  ;;  %v630_v30 = vpop.f32.mrb[4].mxu0  ;;  %v422_v31 = vadd.f32 %v627_v18, %v421_v26  ;;  %v638_v32 = vpop.f32.mrb[4].mxu1 }
  0xf6   : > { %410 = vst [vmem:[%s745_s5 + $0x30] sm:$0xff] %v630_v30  ;;  %v357_v33 = vpop.f32.mrb[5].mxu0  ;;  %418 = vst [vmem:[%s745_s5 + $0x70] sm:$0xff] %v638_v32  ;;  %v389_v34 = vpop.f32.mrb[5].mxu1  ;;  %v447_v45 = vmul.f32 %v630_v30, %v630_v30  ;;  %v455_v5 = vmul.f32 %v638_v32, %v638_v32 }
  0xf7   : > { %408 = vst [vmem:[%s745_s5 + $0x20] sm:$0xff] %v357_v33  ;;  %v423_v35 = vadd.f32 %v422_v31, %v357_v33  ;;  %v445_v36 = vmul.f32 %v357_v33, %v357_v33  ;;  %v459_v37 = vadd.f32 %v458_v29, %v444_v28  ;;  %v631_v38 = vpop.f32.mrb[6].mxu0  ;;  %416 = vst [vmem:[%s745_s5 + $0x60] sm:$0xff] %v389_v34  ;;  %v639_v39 = vpop.f32.mrb[6].mxu1 }
  0xf8   : > { %411 = vst [vmem:[%s745_s5 + $0x38] sm:$0xff] %v631_v38  ;;  %v360_v40 = vpop.f32.mrb[7].mxu0  ;;  %419 = vst [vmem:[%s745_s5 + $0x78] sm:$0xff] %v639_v39  ;;  %v392_v41 = vpop.f32.mrb[7].mxu1  ;;  %v448_v48 = vmul.f32 %v631_v38, %v631_v38  ;;  %v453_v63 = vmul.f32 %v389_v34, %v389_v34  ;;  %v456_v8 = vmul.f32 %v639_v39, %v639_v39 }
  0xf9   : > { %v460_v42 = vadd.f32 %v459_v37, %v445_v36  ;;  %409 = vst [vmem:[%s745_s5 + $0x28] sm:$0xff] %v360_v40  ;;  %v424_v43 = vadd.f32 %v423_v35, %v360_v40  ;;  %v446_v44 = vmul.f32 %v360_v40, %v360_v40  ;;  %417 = vst [vmem:[%s745_s5 + $0x68] sm:$0xff] %v392_v41 }
  0xfa   : > { %v454_v4 = vmul.f32 %v392_v41, %v392_v41 }
  0xfb   : > { %v425_v46 = vadd.f32 %v630_v30, %v424_v43  ;;  %v461_v47 = vadd.f32 %v460_v42, %v446_v44 }
  0xfd   : > { %v462_v49 = vadd.f32 %v461_v47, %v447_v45  ;;  %v426_v50 = vadd.f32 %v631_v38, %v425_v46 }
  0xff   : > { %v427_v52 = vadd.f32 %v426_v50, %v373_v17  ;;  %v463_v53 = vadd.f32 %v462_v49, %v448_v48 }
 0x101   : > { %v464_v54 = vadd.f32 %v463_v53, %v449_v51  ;;  %v428_v55 = vadd.f32 %v427_v52, %v376_v21 }
 0x103   : > { %v429_v58 = vadd.f32 %v634_v15, %v428_v55  ;;  %v465_v59 = vadd.f32 %v464_v54, %v450_v56 }
 0x105   : > { %v466_v61 = vadd.f32 %v465_v59, %v451_v57  ;;  %v430_v62 = vadd.f32 %v635_v19, %v429_v58 }
 0x107   : > { %v431_v0 = vadd.f32 %v430_v62, %v389_v34  ;;  %v467_v1 = vadd.f32 %v466_v61, %v452_v60 }
 0x109   : > { %v468_v2 = vadd.f32 %v467_v1, %v453_v63  ;;  %v432_v3 = vadd.f32 %v431_v0, %v392_v41 }
 0x10b   : > { %v433_v6 = vadd.f32 %v638_v32, %v432_v3  ;;  %v469_v7 = vadd.f32 %v468_v2, %v454_v4 }
 0x10d   : > { %v434_v9 = vadd.f32 %v639_v39, %v433_v6  ;;  %v470_v10 = vadd.f32 %v469_v7, %v455_v5 }
 0x10f   : > { %v435_v11 = vrot.slane %v434_v9, 4  ;;  %v471_v12 = vadd.f32 %v470_v10, %v456_v8 }
 0x111   : > { %v436_v13 = vadd.f32 %v435_v11, %v434_v9  ;;  %v472_v14 = vrot.slane %v471_v12, 4 }
 0x113   : > { %v437_v15 = vrot.slane %v436_v13, 2  ;;  %v473_v16 = vadd.f32 %v472_v14, %v471_v12 }
 0x115   : > { %v438_v17 = vadd.f32 %v437_v15, %v436_v13  ;;  %v474_v18 = vrot.slane %v473_v16, 2 }
 0x117   : > { %v439_v19 = vrot.slane %v438_v17, 1  ;;  %v475_v20 = vadd.f32 %v474_v18, %v473_v16 }
 0x119   : > { %v476_v21 = vrot.slane %v475_v20, 1  ;;  %v440_v22 = vadd.f32 %v439_v19, %v438_v17 }
 0x11b   : > { %v477_v23 = vadd.f32 %v476_v21, %v475_v20 }
 0x11d   : > { %v479_v24 = vsel %vm478_vm2, %v440_v22, %v477_v23 }
 0x11e   : > { %480 = vst [vmem:[%s184_s9] sm:$0x3] %v479_v24 }
 0x11f PF: > { %s14_s12 = sadd.s32 1, %s679_s12  }
 0x120   : > { %p11_p5 = scmp.ge.s32.totalorder %s14_s12, 6  }
 0x122   :  { %13 = sbr.rel (!%p11_p5) target bundleno = 1 (0x1), region = 70 }

// kernel: up_block_forward.4
= control target key start
LH: loop header
LB: loop body
LE: loop exit
PB: predicated region body
PF: predicated region fallthrough
CT: control target
= control target key end

     0   :  { %s516_s12 = smov 0   ;;  %s607_s0 = inlined_call_operand.vmem [shape: f32[512,128], index: 0, kind: input, shape index: {}]   ;;  %s608_s1 = inlined_call_operand.vmem [shape: f32[1,128], index: 1, kind: input, shape index: {}]   ;;  %s609_s2 = inlined_call_operand.vmem [shape: f32[1,128], index: 2, kind: input, shape index: {}]   ;;  %s610_s3 = inlined_call_operand.vmem [shape: bf16[512,128], index: 3, kind: output, shape index: {}]  }
   0x1 LB: > { %s388_s13 = sadd.s32 4294967295, %s494_s12   ;;  %p392_p0 = scmp.ge.s32.totalorder %s494_s12, 1  ;;  %s494_s12 = sphi %s516_s12, %s13_s12  }
   0x2   : > { %p138_p1 = scmp.lt.s32.totalorder %s494_s12, 5 }
   0x4   : > { %p139_p2 = pnand %p392_p0, %p138_p1 }
   0x5   : > { %s393_s14 = sshll.u32 (!%p139_p2), %s388_s13, 4  ;;  %v530_v0 = vld [vmem:[%s608_s1] ss:$0 sm:$0xff] (!%p139_p2) }
   0x6   : > { %142 = sbr.rel (%p139_p2) target bundleno = 37 (0x25), region = 32  ;;  %p163_p3 = scmp.lt.s32.totalorder (!%p139_p2), %s393_s14, 63  ;;  %v540_v1 = vld [vmem:[%s609_s2] ss:$0 sm:$0xff] (!%p139_p2) }
   0xd   : > { %s612_s14 = smov (!%p163_p3, %s393_s14), 63 }
   0xe   : > { %s394_s15 = sshll.u32 %s612_s14, 3  ;;  %s396_s23 = sshll.u32 %s612_s14, 2 }
   0xf   : > { %s535_s20 = scalar_lea.vmem %s607_s0, %s394_s15  ;;  %s572_s26 = scalar_lea.vmem %s610_s3, %s396_s23 }
  0x10   : > { %v174_v2 = vld [vmem:[%s535_s20] sm:$0xff]  ;;  %v175_v3 = vld [vmem:[%s535_s20 + $0x8] sm:$0xff]  ;;  %v176_v4 = vld [vmem:[%s535_s20 + $0x10] sm:$0xff] }
  0x11   : > { %v197_v5 = vmul.f32 %v530_v0, %v174_v2  ;;  %v198_v6 = vmul.f32 %v530_v0, %v175_v3  ;;  %v177_v7 = vld [vmem:[%s535_s20 + $0x18] sm:$0xff]  ;;  %v199_v8 = vmul.f32 %v530_v0, %v176_v4  ;;  %v178_v9 = vld [vmem:[%s535_s20 + $0x20] sm:$0xff]  ;;  %v179_v10 = vld [vmem:[%s535_s20 + $0x28] sm:$0xff] }
  0x12   : > { %v200_v11 = vmul.f32 %v530_v0, %v177_v7  ;;  %v201_v12 = vmul.f32 %v530_v0, %v178_v9  ;;  %v202_v13 = vmul.f32 %v530_v0, %v179_v10  ;;  %v180_v14 = vld [vmem:[%s535_s20 + $0x30] sm:$0xff]  ;;  %v181_v15 = vld [vmem:[%s535_s20 + $0x38] sm:$0xff]  ;;  %v182_v24 = vld [vmem:[%s535_s20 + $0x40] sm:$0xff] }
  0x13   : > { %v220_v16 = vadd.f32 %v540_v1, %v197_v5  ;;  %v221_v17 = vadd.f32 %v540_v1, %v198_v6  ;;  %v222_v18 = vadd.f32 %v540_v1, %v199_v8  ;;  %v203_v19 = vmul.f32 %v530_v0, %v180_v14  ;;  %v183_v25 = vld [vmem:[%s535_s20 + $0x48] sm:$0xff]  ;;  %v184_v30 = vld [vmem:[%s535_s20 + $0x50] sm:$0xff]  ;;  %v185_v35 = vld [vmem:[%s535_s20 + $0x58] sm:$0xff] }
  0x14   : > { %v223_v20 = vadd.f32 %v540_v1, %v200_v11  ;;  %v224_v21 = vadd.f32 %v540_v1, %v201_v12  ;;  %v225_v22 = vadd.f32 %v540_v1, %v202_v13  ;;  %v204_v23 = vmul.f32 %v530_v0, %v181_v15  ;;  %v186_v36 = vld [vmem:[%s535_s20 + $0x60] sm:$0xff]  ;;  %v187_v41 = vld [vmem:[%s535_s20 + $0x68] sm:$0xff]  ;;  %v188_v42 = vld [vmem:[%s535_s20 + $0x70] sm:$0xff] }
  0x15   : > { %v236_v26 = vmax.f32 %v220_v16, 0.0  ;;  %v237_v27 = vmax.f32 %v221_v17, 0.0  ;;  %v238_v28 = vmax.f32 %v222_v18, 0.0  ;;  %v226_v29 = vadd.f32 %v540_v1, %v203_v19  ;;  %v189_v51 = vld [vmem:[%s535_s20 + $0x78] sm:$0xff] }
  0x16   : > { %v239_v31 = vmax.f32 %v223_v20, 0.0  ;;  %v240_v32 = vmax.f32 %v224_v21, 0.0  ;;  %v241_v33 = vmax.f32 %v225_v22, 0.0  ;;  %v227_v34 = vadd.f32 %v540_v1, %v204_v23 }
  0x17   : > { %v436_v37 = vpack.c.bf16 %v237_v27, %v236_v26  ;;  %v242_v38 = vmax.f32 %v226_v29, 0.0  ;;  %v205_v39 = vmul.f32 %v530_v0, %v182_v24  ;;  %v206_v40 = vmul.f32 %v530_v0, %v183_v25 }
  0x18   : > { %v441_v43 = vpack.c.bf16 %v239_v31, %v238_v28  ;;  %v446_v44 = vpack.c.bf16 %v241_v33, %v240_v32  ;;  %v243_v45 = vmax.f32 %v227_v34, 0.0  ;;  %v207_v46 = vmul.f32 %v530_v0, %v184_v30 }
  0x19   : > { %437 = vst [vmem:[%s572_s26] sm:$0xff] %v436_v37   ;;  %v228_v47 = vadd.f32 %v540_v1, %v205_v39  ;;  %v229_v48 = vadd.f32 %v540_v1, %v206_v40  ;;  %v208_v49 = vmul.f32 %v530_v0, %v185_v35  ;;  %v209_v50 = vmul.f32 %v530_v0, %v186_v36 }
  0x1a   : > { %473 = vst [vmem:[%s572_s26 + $0x8] sm:$0xff] %v441_v43   ;;  %474 = vst [vmem:[%s572_s26 + $0x10] sm:$0xff] %v446_v44   ;;  %v451_v52 = vpack.c.bf16 %v243_v45, %v242_v38  ;;  %v230_v53 = vadd.f32 %v540_v1, %v207_v46  ;;  %v210_v54 = vmul.f32 %v530_v0, %v187_v41 }
  0x1b   : > { %v211_v55 = vmul.f32 %v530_v0, %v188_v42  ;;  %v244_v56 = vmax.f32 %v228_v47, 0.0  ;;  %v245_v57 = vmax.f32 %v229_v48, 0.0  ;;  %v231_v58 = vadd.f32 %v540_v1, %v208_v49 }
  0x1c   : > { %v232_v59 = vadd.f32 %v540_v1, %v209_v50  ;;  %475 = vst [vmem:[%s572_s26 + $0x18] sm:$0xff] %v451_v52   ;;  %v246_v60 = vmax.f32 %v230_v53, 0.0  ;;  %v233_v61 = vadd.f32 %v540_v1, %v210_v54  ;;  %v212_v62 = vmul.f32 %v530_v0, %v189_v51 }
  0x1d   : > { %v234_v63 = vadd.f32 %v540_v1, %v211_v55  ;;  %v456_v2 = vpack.c.bf16 %v245_v57, %v244_v56  ;;  %v247_v3 = vmax.f32 %v231_v58, 0.0 }
  0x1e   : > { %v248_v4 = vmax.f32 %v232_v59, 0.0  ;;  %v249_v5 = vmax.f32 %v233_v61, 0.0  ;;  %v235_v6 = vadd.f32 %v540_v1, %v212_v62 }
  0x1f   : > { %v250_v7 = vmax.f32 %v234_v63, 0.0  ;;  %476 = vst [vmem:[%s572_s26 + $0x20] sm:$0xff] %v456_v2   ;;  %v461_v8 = vpack.c.bf16 %v247_v3, %v246_v60 }
  0x20   : > { %v466_v9 = vpack.c.bf16 %v249_v5, %v248_v4  ;;  %v251_v10 = vmax.f32 %v235_v6, 0.0 }
  0x21   : > { %477 = vst [vmem:[%s572_s26 + $0x28] sm:$0xff] %v461_v8  }
  0x22   : > { %478 = vst [vmem:[%s572_s26 + $0x30] sm:$0xff] %v466_v9   ;;  %v471_v11 = vpack.c.bf16 %v251_v10, %v250_v7 }
  0x24   : > { %479 = vst [vmem:[%s572_s26 + $0x38] sm:$0xff] %v471_v11  }
  0x25 PF: > { %s13_s12 = sadd.s32 1, %s494_s12  }
  0x26   : > { %p10_p4 = scmp.ge.s32.totalorder %s13_s12, 6  }
  0x28   :  { %12 = sbr.rel (!%p10_p4) target bundleno = 1 (0x1), region = 62 }

// kernel: up_block_forward.5
= control target key start
LH: loop header
LB: loop body
LE: loop exit
PB: predicated region body
PF: predicated region fallthrough
CT: control target
= control target key end

     0   :  { %s705_s15 = smov 0   ;;  %s809_s0 = inlined_call_operand.vmem [shape: bf16[512,72], index: 0, kind: input, shape index: {}]   ;;  %s810_s1 = inlined_call_operand.vmem [shape: bf16[72,128], index: 1, kind: input, shape index: {}]   ;;  %s811_s2 = inlined_call_operand.vmem [shape: f32[1,128], index: 2, kind: input, shape index: {}]   ;;  %s812_s3 = inlined_call_operand.vmem [shape: f32[512,128], index: 3, kind: input, shape index: {}]   ;;  %s813_s4 = inlined_call_operand.vmem [shape: f32[512,128], index: 4, kind: output, shape index: {}]  }
   0x1 LB: > { %s565_s16 = sadd.s32 4294967295, %s678_s15   ;;  %p569_p0 = scmp.ge.s32.totalorder %s678_s15, 1  ;;  %s678_s15 = sphi %s705_s15, %s14_s15  }
   0x2   : > { %p174_p1 = scmp.lt.s32.totalorder %s678_s15, 5 }
   0x4   : > { %p175_p2 = pnand %p569_p0, %p174_p1 }
   0x5   : > { %v659_v0 = vld [vmem:[%s810_s1] sm:$0xff] (!%p175_p2)   ;;  %v660_v1 = vld [vmem:[%s810_s1 + $0x8] sm:$0xff] (!%p175_p2)   ;;  %s570_s21 = sshll.u32 (!%p175_p2), %s565_s16, 4  ;;  %v661_v2 = vld [vmem:[%s810_s1 + $0x10] sm:$0xff] (!%p175_p2)   ;;  %vm323_vm0 = vcmask (!%p175_p2), 588800   ;;  %vm348_vm1 = vcmask (!%p175_p2), 1043456  }
   0x6   : > { %178 = sbr.rel (%p175_p2) target bundleno = 254 (0xfe), region = 36  ;;  %613 = vmatprep.subr.bf16.mxu0 (!%p175_p2), %v659_v0  ;;  %639 = vmatprep.subr.bf16.mxu1 (!%p175_p2), %v659_v0  ;;  %p206_p3 = scmp.lt.s32.totalorder (!%p175_p2), %s570_s21, 63  ;;  %v662_v3 = vld [vmem:[%s810_s1 + $0x18] sm:$0xff] (!%p175_p2)   ;;  %v663_v6 = vld [vmem:[%s810_s1 + $0x20] ss:$0 sps:$4 sm:$0xff] (!%p175_p2)  }
   0x7   : > { %614 = vmatpush3.bf16.msra.mxu0 (!%p175_p2), %v659_v0  ;;  %644 = vmatpush3.bf16.msra.mxu1 (!%p175_p2), %v659_v0  ;;  %v350_v7 = vsel (!%p175_p2), %vm348_vm1, %v663_v6, 0  ;;  %v751_v14 = vld [vmem:[%s811_s2] ss:$0 sm:$0xff] (!%p175_p2) }
   0x8   : > { %615 = vmatprep.subr.bf16.mxu0 (!%p175_p2), %v660_v1  ;;  %640 = vmatprep.subr.bf16.mxu1 (!%p175_p2), %v660_v1 }
   0xb   : > { %616 = vmatpush3.bf16.msra.mxu0 (!%p175_p2), %v660_v1  ;;  %645 = vmatpush3.bf16.msra.mxu1 (!%p175_p2), %v660_v1 }
   0xc   : > { %617 = vmatprep.subr.bf16.mxu0 (!%p175_p2), %v661_v2  ;;  %641 = vmatprep.subr.bf16.mxu1 (!%p175_p2), %v661_v2 }
   0xd   : > { %s815_s21 = smov (!%p206_p3, %s570_s21), 63 }
   0xe   : > { %s571_s24 = sshll.u32 %s815_s21, 2  ;;  %s573_s6 = sshll.u32 %s815_s21, 3 }
   0xf   : > { %s209_s29 = scalar_lea.vmem %s809_s0, %s571_s24  ;;  %618 = vmatpush3.bf16.msra.mxu0 %v661_v2  ;;  %646 = vmatpush3.bf16.msra.mxu1 %v661_v2  ;;  %s746_s9 = scalar_lea.vmem %s812_s3, %s573_s6 }
  0x10   : > { %v664_v4 = vld [vmem:[%s209_s29] sm:$0xff]   ;;  %619 = vmatprep.subr.bf16.mxu0 %v662_v3  ;;  %642 = vmatprep.subr.bf16.mxu1 %v662_v3  ;;  %v666_v8 = vld [vmem:[%s209_s29 + $0x8] sm:$0xff]   ;;  %v668_v10 = vld [vmem:[%s209_s29 + $0x10] sm:$0xff]   ;;  %s762_s14 = scalar_lea.vmem %s813_s4, %s573_s6 }
  0x11   : > { %v665_v5 = vld [vmem:[%s209_s29 + $0x20] sm:$0xff]   ;;  %623 = vmatprep.mubr.msk.bf16.mxu0 %vm323_vm0, %v664_v4  ;;  %v667_v9 = vld [vmem:[%s209_s29 + $0x28] sm:$0xff]   ;;  %v669_v11 = vld [vmem:[%s209_s29 + $0x30] sm:$0xff]  }
  0x12   : > { %631 = vmatprep.mubr.msk.bf16.mxu1 %vm323_vm0, %v665_v5  ;;  %v670_v12 = vld [vmem:[%s209_s29 + $0x18] sm:$0xff]   ;;  %v451_v16 = vld [vmem:[%s746_s9 + $0x10] sm:$0xff]  ;;  %v449_v22 = vld [vmem:[%s746_s9] sm:$0xff] }
  0x13   : > { %620 = vmatpush3.bf16.msra.mxu0 %v662_v3  ;;  %647 = vmatpush3.bf16.msra.mxu1 %v662_v3  ;;  %v671_v13 = vld [vmem:[%s209_s29 + $0x38] sm:$0xff]   ;;  %v459_v18 = vld [vmem:[%s746_s9 + $0x50] sm:$0xff]  ;;  %v457_v24 = vld [vmem:[%s746_s9 + $0x40] sm:$0xff] }
  0x14   : > { %649 = vmatprep.subr.msk.bf16.mxu0 %vm348_vm1, %v663_v6  ;;  %650 = vmatprep.subr.msk.bf16.mxu1 %vm348_vm1, %v663_v6  ;;  %v452_v28 = vld [vmem:[%s746_s9 + $0x18] sm:$0xff]  ;;  %v450_v36 = vld [vmem:[%s746_s9 + $0x8] sm:$0xff]  ;;  %v455_v48 = vld [vmem:[%s746_s9 + $0x30] sm:$0xff] }
  0x15   : > { %v460_v30 = vld [vmem:[%s746_s9 + $0x58] sm:$0xff]  ;;  %v458_v38 = vld [vmem:[%s746_s9 + $0x48] sm:$0xff]  ;;  %v463_v50 = vld [vmem:[%s746_s9 + $0x70] sm:$0xff] }
  0x16   : > { %v453_v54 = vld [vmem:[%s746_s9 + $0x20] sm:$0xff]  ;;  %v456_v60 = vld [vmem:[%s746_s9 + $0x38] sm:$0xff]  ;;  %v454_v4 = vld [vmem:[%s746_s9 + $0x28] sm:$0xff] }
  0x17   : > { %622 = vmatpush3.bf16.msra.mxu0 %v350_v7  ;;  %648 = vmatpush3.bf16.msra.mxu1 %v350_v7  ;;  %v461_v56 = vld [vmem:[%s746_s9 + $0x60] sm:$0xff]  ;;  %v464_v62 = vld [vmem:[%s746_s9 + $0x78] sm:$0xff]  ;;  %v462_v6 = vld [vmem:[%s746_s9 + $0x68] sm:$0xff] }
  0x1a   : > { %624 = vmatmul.mubr.msk.bf16.vlgmr.msra.gmra.mrb[0].mxu0 %vm323_vm0, %v666_v8  ;;  %632 = vmatmul.mubr.msk.bf16.vlgmr.msra.gmra.mrb[0].mxu1 %vm323_vm0, %v667_v9 }
  0x1b   : > { %627 = vmatprep.mubr.msk.bf16.mxu0 %vm323_vm0, %v668_v10  ;;  %635 = vmatprep.mubr.msk.bf16.mxu1 %vm323_vm0, %v669_v11 }
  0x22   : > { %628 = vmatmul.mubr.msk.bf16.gmra.mrb[4].mxu0 %vm323_vm0, %v670_v12  ;;  %636 = vmatmul.mubr.msk.bf16.gmra.mrb[4].mxu1 %vm323_vm0, %v671_v13 }
  0xed   : > { %v625_v15 = vpop.f32.mrb[0].mxu0  ;;  %v633_v17 = vpop.f32.mrb[0].mxu1 }
  0xee   : > { %v395_v19 = vadd.f32 %v625_v15, %v751_v14  ;;  %v427_v20 = vadd.f32 %v633_v17, %v751_v14  ;;  %v386_v21 = vpop.f32.mrb[1].mxu0  ;;  %v418_v23 = vpop.f32.mrb[1].mxu1 }
  0xef   : > { %v387_v25 = vadd.f32 %v751_v14, %v386_v21  ;;  %v419_v26 = vadd.f32 %v751_v14, %v418_v23  ;;  %v626_v27 = vpop.f32.mrb[2].mxu0  ;;  %v634_v29 = vpop.f32.mrb[2].mxu1 }
  0xf0   : > { %v467_v31 = vadd.f32 %v451_v16, %v395_v19  ;;  %v475_v32 = vadd.f32 %v459_v18, %v427_v20  ;;  %v398_v33 = vadd.f32 %v626_v27, %v751_v14  ;;  %v430_v34 = vadd.f32 %v634_v29, %v751_v14  ;;  %v389_v35 = vpop.f32.mrb[3].mxu0  ;;  %v421_v37 = vpop.f32.mrb[3].mxu1 }
  0xf1   : > { %v465_v39 = vadd.f32 %v449_v22, %v387_v25  ;;  %v473_v40 = vadd.f32 %v457_v24, %v419_v26  ;;  %v390_v41 = vadd.f32 %v751_v14, %v389_v35  ;;  %v422_v42 = vadd.f32 %v751_v14, %v421_v37 }
  0xf2   : > { %483 = vst [vmem:[%s762_s14 + $0x10] sm:$0xff] %v467_v31  ;;  %491 = vst [vmem:[%s762_s14 + $0x50] sm:$0xff] %v475_v32  ;;  %v468_v43 = vadd.f32 %v452_v28, %v398_v33  ;;  %v476_v44 = vadd.f32 %v460_v30, %v430_v34 }
  0xf3   : > { %481 = vst [vmem:[%s762_s14] sm:$0xff] %v465_v39  ;;  %489 = vst [vmem:[%s762_s14 + $0x40] sm:$0xff] %v473_v40  ;;  %v466_v45 = vadd.f32 %v450_v36, %v390_v41  ;;  %v474_v46 = vadd.f32 %v458_v38, %v422_v42 }
  0xf4   : > { %484 = vst [vmem:[%s762_s14 + $0x18] sm:$0xff] %v468_v43  ;;  %492 = vst [vmem:[%s762_s14 + $0x58] sm:$0xff] %v476_v44 }
  0xf5   : > { %482 = vst [vmem:[%s762_s14 + $0x8] sm:$0xff] %v466_v45  ;;  %490 = vst [vmem:[%s762_s14 + $0x48] sm:$0xff] %v474_v46  ;;  %v629_v47 = vpop.f32.mrb[4].mxu0  ;;  %v637_v49 = vpop.f32.mrb[4].mxu1 }
  0xf6   : > { %v411_v51 = vadd.f32 %v629_v47, %v751_v14  ;;  %v443_v52 = vadd.f32 %v637_v49, %v751_v14  ;;  %v402_v53 = vpop.f32.mrb[5].mxu0  ;;  %v434_v55 = vpop.f32.mrb[5].mxu1 }
  0xf7   : > { %v403_v57 = vadd.f32 %v751_v14, %v402_v53  ;;  %v435_v58 = vadd.f32 %v751_v14, %v434_v55  ;;  %v630_v59 = vpop.f32.mrb[6].mxu0  ;;  %v638_v61 = vpop.f32.mrb[6].mxu1 }
  0xf8   : > { %v471_v63 = vadd.f32 %v455_v48, %v411_v51  ;;  %v479_v0 = vadd.f32 %v463_v50, %v443_v52  ;;  %v414_v1 = vadd.f32 %v630_v59, %v751_v14  ;;  %v446_v2 = vadd.f32 %v638_v61, %v751_v14  ;;  %v405_v3 = vpop.f32.mrb[7].mxu0  ;;  %v437_v5 = vpop.f32.mrb[7].mxu1 }
  0xf9   : > { %v469_v7 = vadd.f32 %v453_v54, %v403_v57  ;;  %v477_v8 = vadd.f32 %v461_v56, %v435_v58  ;;  %v406_v9 = vadd.f32 %v751_v14, %v405_v3  ;;  %v438_v10 = vadd.f32 %v751_v14, %v437_v5 }
  0xfa   : > { %487 = vst [vmem:[%s762_s14 + $0x30] sm:$0xff] %v471_v63  ;;  %495 = vst [vmem:[%s762_s14 + $0x70] sm:$0xff] %v479_v0  ;;  %v472_v11 = vadd.f32 %v456_v60, %v414_v1  ;;  %v480_v12 = vadd.f32 %v464_v62, %v446_v2 }
  0xfb   : > { %485 = vst [vmem:[%s762_s14 + $0x20] sm:$0xff] %v469_v7  ;;  %493 = vst [vmem:[%s762_s14 + $0x60] sm:$0xff] %v477_v8  ;;  %v470_v13 = vadd.f32 %v454_v4, %v406_v9  ;;  %v478_v15 = vadd.f32 %v462_v6, %v438_v10 }
  0xfc   : > { %488 = vst [vmem:[%s762_s14 + $0x38] sm:$0xff] %v472_v11  ;;  %496 = vst [vmem:[%s762_s14 + $0x78] sm:$0xff] %v480_v12 }
  0xfd   : > { %486 = vst [vmem:[%s762_s14 + $0x28] sm:$0xff] %v470_v13  ;;  %494 = vst [vmem:[%s762_s14 + $0x68] sm:$0xff] %v478_v15 }
  0xfe PF: > { %s14_s15 = sadd.s32 1, %s678_s15  }
  0xff   : > { %p11_p4 = scmp.ge.s32.totalorder %s14_s15, 6  }
 0x101   :  { %13 = sbr.rel (!%p11_p4) target bundleno = 1 (0x1), region = 69 }

</bundles_post_ra>
